<compile_context>
chip_gen: v7x
topology: tpu7x:2x2x1
jax: 0.10.0
libtpu: 0.0.40
codegen_flags: <defaults>
</compile_context>

<pallas_src>
import itertools
import math
from functools import partial

import numpy as np
import jax
import jax.numpy as jnp
from jax import lax
from jax.experimental import pallas as pl
from jax.experimental.pallas import tpu as pltpu


def _round_up(v, m):
    return (v + m - 1) // m * m


# ---------------------------------------------------------------------------
# Pallas kernel: stage windows -> single (OCp, Kp) @ (Kp, N*Lb) MXU contraction.
# ---------------------------------------------------------------------------
def _make_conv_kernel(offsets, N, Mw, Lb, Cp, has_bias):
    # Group kernel offsets by input phase so each (batch, phase) row is loaded once.
    by_phase = {}
    for ko, (phase, q0) in enumerate(offsets):
        by_phase.setdefault(phase, []).append((ko, q0))

    def kernel(*refs):
        if has_bias:
            x_ref, w_ref, b_ref, o_ref, s_ref = refs
        else:
            x_ref, w_ref, o_ref, s_ref = refs
            b_ref = None
        # Stage: s[ko*Cp:(ko+1)*Cp, n*Lb : n*Lb+Mw] = x[n, phase, :, q0:q0+Mw].
        # Rows are sublane-aligned (Cp multiple of 8), columns 128-aligned per batch;
        # only the window shift costs a lane rotate (XLU is otherwise idle here).
        for n in range(N):
            col = n * Lb
            for phase, items in by_phase.items():
                row = x_ref[n, phase]                           # (Cp, Qprod) aligned load
                for ko, q0 in items:
                    s_ref[pl.ds(ko * Cp, Cp), pl.ds(col, Mw)] = row[:, q0:q0 + Mw]
        # One fused MXU dot over K = kprod*Cp with N*Lb lanes on the RHS.
        acc = jnp.dot(w_ref[...], s_ref[...], preferred_element_type=jnp.float32)
        if has_bias:
            acc = acc + b_ref[...]                              # (OCp, 1) lane broadcast
        for n in range(N):                                      # 128-aligned, unmasked stores
            o_ref[n] = acc[:, n * Lb:(n + 1) * Lb].astype(o_ref.dtype)

    return kernel


# ---------------------------------------------------------------------------
# Host glue (tiny, single passes; no kprod amplification, no HBM im2col).
# ---------------------------------------------------------------------------
def _prepare_input(x, strides, cp):
    """(N, C, *S) -> (N, P, cp, Qprod) with x_ph[n, flat(r), c, flat(q)] = x[n, c, q*s + r]."""
    N, C = int(x.shape[0]), int(x.shape[1])
    S = tuple(int(s) for s in x.shape[2:])
    d = len(strides)
    if all(s == 1 for s in strides):                            # stride removal is a no-op
        if C < cp:
            x = jnp.pad(x, [(0, 0), (0, cp - C)] + [(0, 0)] * d)
        return x.reshape(N, 1, cp, int(np.prod(S))), S
    pads = [(-S[i]) % strides[i] for i in range(d)]
    widths = [(0, 0), (0, cp - C)] + [(0, p) for p in pads]
    if any(w != (0, 0) for w in widths):
        x = jnp.pad(x, widths)
    Sp = tuple(int(s) for s in x.shape[2:])
    Q = tuple(Sp[i] // strides[i] for i in range(d))
    xr = x.reshape((N, cp) + tuple(v for i in range(d) for v in (Q[i], strides[i])))
    perm = (0,) + tuple(3 + 2 * i for i in range(d)) + (1,) + tuple(2 + 2 * i for i in range(d))
    xt = jnp.transpose(xr, perm)                                # (N, s1..sd, cp, Q1..Qd)
    return xt.reshape(N, int(np.prod(strides)), cp, int(np.prod(Q))), Q


def _unflatten_output(y, out_spatial, Q):
    """(N, OC, L) flat on the Q grid (L >= Mw; junk lanes dropped) -> (N, OC, *out_spatial)."""
    d = len(out_spatial)
    for i in range(d - 1):
        stride = int(np.prod(Q[i + 1:]))
        need = out_spatial[i] * stride
        cur = int(y.shape[-1])
        if cur < need:
            y = jnp.pad(y, [(0, 0)] * (y.ndim - 1) + [(0, need - cur)])
        elif cur > need:
            y = y[..., :need]
        y = y.reshape(y.shape[:-1] + (out_spatial[i], stride))
    return y[..., : out_spatial[-1]]


@partial(jax.jit, static_argnames=("kshape", "strides", "oc"))
def _conv_forward(x, w_pad, b_pad, *, kshape, strides, oc):
    N = int(x.shape[0])
    S = tuple(int(s) for s in x.shape[2:])
    d = len(kshape)
    kprod = int(np.prod(kshape))
    ocp = int(w_pad.shape[0])                                   # OC padded to sublane tile
    cp = int(w_pad.shape[1]) // kprod                           # C  padded to sublane tile
    out_spatial = tuple((S[i] - kshape[i]) // strides[i] + 1 for i in range(d))

    x_ph, Q = _prepare_input(x.astype(jnp.float32), strides, cp)
    P, Qprod = int(x_ph.shape[1]), int(x_ph.shape[3])

    qstr = [int(np.prod(Q[i + 1:])) for i in range(d)]          # flat strides on Q grid
    sstr = [int(np.prod(strides[i + 1:])) for i in range(d)]    # flat strides over phases
    Mw = sum((out_spatial[i] - 1) * qstr[i] for i in range(d)) + 1
    Lb = _round_up(Mw, 128)                                     # lane-dense, 128-aligned out

    offsets = []
    for koffs in itertools.product(*[range(k) for k in kshape]):
        phase = sum((koffs[i] % strides[i]) * sstr[i] for i in range(d))
        q0 = sum((koffs[i] // strides[i]) * qstr[i] for i in range(d))
        offsets.append((phase, q0))
    Kp = kprod * cp

    has_bias = b_pad is not None
    kernel = _make_conv_kernel(offsets, N, Mw, Lb, cp, has_bias)

    in_specs = [
        pl.BlockSpec((N, P, cp, Qprod), lambda i: (0, 0, 0, 0)),   # whole input resident
        pl.BlockSpec((ocp, Kp), lambda i: (0, 0)),                 # one contiguous weight DMA
    ]
    args = [x_ph, w_pad]
    if has_bias:
        in_specs.append(pl.BlockSpec((ocp, 1), lambda i: (0, 0)))
        args.append(b_pad)

    out = pl.pallas_call(
        kernel,
        out_shape=jax.ShapeDtypeStruct((N, ocp, Lb), jnp.float32),
        grid=(1,),   # TODO(synk): on v7x a size-2 "parallel" axis over lane halves would use both TCs
        in_specs=in_specs,
        out_specs=pl.BlockSpec((N, ocp, Lb), lambda i: (0, 0, 0)),
        scratch_shapes=[pltpu.VMEM((Kp, N * Lb), jnp.float32)],
        compiler_params=pltpu.CompilerParams(dimension_semantics=("arbitrary",)),
    )(*args)

    return _unflatten_output(out[:, :oc, :], out_spatial, Q)


class PallasConv:
    """Conv layer: weights pre-packed once to a lane-dense (OCp, kprod*Cp) block."""

    def __init__(self, weight, bias, strides):
        weight = jnp.asarray(weight, jnp.float32)
        self.oc = int(weight.shape[0])
        self.c = int(weight.shape[1])
        self.kshape = tuple(int(k) for k in weight.shape[2:])
        self.strides = tuple(int(s) for s in strides)
        kprod = int(np.prod(self.kshape))
        ocp = _round_up(self.oc, 8)
        cp = _round_up(self.c, 8)
        # (OC, C, *K) -> (OCp, kprod*Cp): kernel-offset-major, channel-minor columns.
        w = weight.reshape(self.oc, self.c, kprod).transpose(0, 2, 1)
        w = jnp.pad(w, ((0, ocp - self.oc), (0, 0), (0, cp - self.c)))
        self.w_pad = w.reshape(ocp, kprod * cp)
        if bias is not None:
            self.b_pad = jnp.pad(jnp.asarray(bias, jnp.float32),
                                 (0, ocp - self.oc)).reshape(ocp, 1)
        else:
            self.b_pad = None

    def __call__(self, x):
        return _conv_forward(x, self.w_pad, self.b_pad,
                             kshape=self.kshape, strides=self.strides, oc=self.oc)


# ---------------------------------------------------------------------------
# Deterministic parameter init (PyTorch default: U(-1/sqrt(fan_in), 1/sqrt(fan_in))).
# ---------------------------------------------------------------------------
def _init_conv_params(key, out_c, in_c, kernel_shape, bias=True):
    fan_in = in_c * int(np.prod(kernel_shape))
    bound = 1.0 / math.sqrt(fan_in)
    kw, kb = jax.random.split(key)
    w = jax.random.uniform(kw, (out_c, in_c) + tuple(kernel_shape), jnp.float32, -bound, bound)
    b = jax.random.uniform(kb, (out_c,), jnp.float32, -bound, bound) if bias else None
    return w, b


def _ref_conv(x, w, b, strides):
    nd = len(strides)
    sp = "DHW"[-nd:]
    dn = ("NC" + sp, "OI" + sp, "NC" + sp)
    out = lax.conv_general_dilated(x, w, strides, "VALID", dimension_numbers=dn)
    if b is not None:
        out = out + b.reshape((1, -1) + (1,) * nd)
    return out


if __name__ == "__main__":
    key = jax.random.PRNGKey(0)
    keys = jax.random.split(key, 16)

    # Parameters from Model.__init__ (shapes reproduced exactly).
    w0, b0 = _init_conv_params(keys[0], 8, 4, (3, 3), bias=True)      # Conv2d(4, 8, 3)
    w1, b1 = _init_conv_params(keys[1], 7, 4, (2, 2), bias=True)      # Conv2d(4, 7, 2, stride=1)
    w2, _ = _init_conv_params(keys[2], 6, 8, (2, 2), bias=False)      # Conv2d(8, 6, 2, stride=2, bias=False)
    w3, _ = _init_conv_params(keys[3], 3, 2, (1,), bias=False)        # Conv1d(2, 3, 1, bias=False)
    w4, b4 = _init_conv_params(keys[4], 5, 3, (3, 3, 3), bias=True)   # Conv3d(3, 5, 3)

    conv = PallasConv(w0, b0, (1, 1))
    conv1 = PallasConv(w1, b1, (1, 1))
    conv2 = PallasConv(w2, None, (2, 2))
    conv3 = PallasConv(w3, None, (1,))
    conv4 = PallasConv(w4, b4, (1, 1, 1))

    # TODO(synk): the chained forward conv4(conv3(conv2(conv1(conv(x))))) is
    # shape-inconsistent in the original PyTorch module (conv emits 8 channels but
    # conv1 expects 4; conv3/conv4 need 3-D/5-D inputs but would receive 4-D), so
    # each conv layer's Pallas kernel is exercised on its own valid deterministic
    # input and checked against lax.conv_general_dilated instead of the chain.
    x0 = jax.random.normal(keys[10], (2, 4, 16, 16), jnp.float32)
    x1 = jax.random.normal(keys[11], (2, 4, 16, 16), jnp.float32)
    x2 = jax.random.normal(keys[12], (2, 8, 16, 16), jnp.float32)
    x3 = jax.random.normal(keys[13], (2, 2, 8), jnp.float32)
    x4 = jax.random.normal(keys[14], (2, 3, 8, 8, 8), jnp.float32)

    cases = [
        (conv, x0, w0, b0, (1, 1)),
        (conv1, x1, w1, b1, (1, 1)),
        (conv2, x2, w2, None, (2, 2)),
        (conv3, x3, w3, None, (1,)),
        (conv4, x4, w4, b4, (1, 1, 1)),
    ]
    for layer, xc, wc, bc, st in cases:
        out = jax.block_until_ready(layer(xc))
        ref = _ref_conv(xc, wc, bc, st)
        assert out.shape == ref.shape, (out.shape, ref.shape)
        err = float(jnp.max(jnp.abs(out - ref)))
        assert err < 1e-4, err

    print("KERNEL_OK")
</pallas_src>

<mosaic_0001>
module attributes {stable_mosaic.version = 11 : i64} {
  func.func @kernel(%arg0: i32, %arg1: memref<2x1x8x256xf32, #tpu.memory_space<vmem>>, %arg2: memref<8x72xf32, #tpu.memory_space<vmem>>, %arg3: memref<8x1xf32, #tpu.memory_space<vmem>>, %arg4: memref<2x8x256xf32, #tpu.memory_space<vmem>>, %arg5: memref<72x512xf32, #tpu.memory_space<vmem>>) attributes {dimension_semantics = [#tpu.dimension_semantics<arbitrary>], iteration_bounds = array<i64: 1>, scalar_prefetch = 0 : i64, scratch_operands = 1 : i64, tpu.core_type = #tpu.core_type<tc>, window_params = [{pipeline_mode = #tpu.pipeline_mode<synchronous>, transform_indices = @transform_0, window_bounds = array<i64: 2, 1, 8, 256>}, {pipeline_mode = #tpu.pipeline_mode<synchronous>, transform_indices = @transform_1, window_bounds = array<i64: 8, 72>}, {pipeline_mode = #tpu.pipeline_mode<synchronous>, transform_indices = @transform_2, window_bounds = array<i64: 8, 1>}, {pipeline_mode = #tpu.pipeline_mode<synchronous>, transform_indices = @transform_3, window_bounds = array<i64: 2, 8, 256>}]} {
    %c0 = arith.constant 0 : index
    %c0_0 = arith.constant 0 : index
    %c0_1 = arith.constant 0 : index
    %c0_2 = arith.constant 0 : index
    %0 = vector.load %arg1[%c0, %c0_0, %c0_1, %c0_2] : memref<2x1x8x256xf32, #tpu.memory_space<vmem>>, vector<1x1x8x256xf32>
    %1 = vector.shape_cast %0 : vector<1x1x8x256xf32> to vector<8x256xf32>
    %2 = vector.extract_strided_slice %1 {offsets = [0, 0], sizes = [8, 222], strides = [1, 1]} : vector<8x256xf32> to vector<8x222xf32>
    %c0_3 = arith.constant 0 : index
    %c0_4 = arith.constant 0 : index
    %3 = vector.load %arg5[%c0_3, %c0_4] : memref<72x512xf32, #tpu.memory_space<vmem>>, vector<8x222xf32>
    tpu.vector_store %arg5[%c0_3, %c0_4], %2 {strides = array<i32>} : memref<72x512xf32, #tpu.memory_space<vmem>>, vector<8x222xf32>,
    %4 = vector.extract_strided_slice %1 {offsets = [0, 1], sizes = [8, 222], strides = [1, 1]} : vector<8x256xf32> to vector<8x222xf32>
    %c8 = arith.constant 8 : index
    %c0_5 = arith.constant 0 : index
    %5 = vector.load %arg5[%c8, %c0_5] : memref<72x512xf32, #tpu.memory_space<vmem>>, vector<8x222xf32>
    tpu.vector_store %arg5[%c8, %c0_5], %4 {strides = array<i32>} : memref<72x512xf32, #tpu.memory_space<vmem>>, vector<8x222xf32>,
    %6 = vector.extract_strided_slice %1 {offsets = [0, 2], sizes = [8, 222], strides = [1, 1]} : vector<8x256xf32> to vector<8x222xf32>
    %c16 = arith.constant 16 : index
    %c0_6 = arith.constant 0 : index
    %7 = vector.load %arg5[%c16, %c0_6] : memref<72x512xf32, #tpu.memory_space<vmem>>, vector<8x222xf32>
    tpu.vector_store %arg5[%c16, %c0_6], %6 {strides = array<i32>} : memref<72x512xf32, #tpu.memory_space<vmem>>, vector<8x222xf32>,
    %8 = vector.extract_strided_slice %1 {offsets = [0, 16], sizes = [8, 222], strides = [1, 1]} : vector<8x256xf32> to vector<8x222xf32>
    %c24 = arith.constant 24 : index
    %c0_7 = arith.constant 0 : index
    %9 = vector.load %arg5[%c24, %c0_7] : memref<72x512xf32, #tpu.memory_space<vmem>>, vector<8x222xf32>
    tpu.vector_store %arg5[%c24, %c0_7], %8 {strides = array<i32>} : memref<72x512xf32, #tpu.memory_space<vmem>>, vector<8x222xf32>,
    %10 = vector.extract_strided_slice %1 {offsets = [0, 17], sizes = [8, 222], strides = [1, 1]} : vector<8x256xf32> to vector<8x222xf32>
    %c32 = arith.constant 32 : index
    %c0_8 = arith.constant 0 : index
    %11 = vector.load %arg5[%c32, %c0_8] : memref<72x512xf32, #tpu.memory_space<vmem>>, vector<8x222xf32>
    tpu.vector_store %arg5[%c32, %c0_8], %10 {strides = array<i32>} : memref<72x512xf32, #tpu.memory_space<vmem>>, vector<8x222xf32>,
    %12 = vector.extract_strided_slice %1 {offsets = [0, 18], sizes = [8, 222], strides = [1, 1]} : vector<8x256xf32> to vector<8x222xf32>
    %c40 = arith.constant 40 : index
    %c0_9 = arith.constant 0 : index
    %13 = vector.load %arg5[%c40, %c0_9] : memref<72x512xf32, #tpu.memory_space<vmem>>, vector<8x222xf32>
    tpu.vector_store %arg5[%c40, %c0_9], %12 {strides = array<i32>} : memref<72x512xf32, #tpu.memory_space<vmem>>, vector<8x222xf32>,
    %14 = vector.extract_strided_slice %1 {offsets = [0, 32], sizes = [8, 222], strides = [1, 1]} : vector<8x256xf32> to vector<8x222xf32>
    %c48 = arith.constant 48 : index
    %c0_10 = arith.constant 0 : index
    %15 = vector.load %arg5[%c48, %c0_10] : memref<72x512xf32, #tpu.memory_space<vmem>>, vector<8x222xf32>
    tpu.vector_store %arg5[%c48, %c0_10], %14 {strides = array<i32>} : memref<72x512xf32, #tpu.memory_space<vmem>>, vector<8x222xf32>,
    %16 = vector.extract_strided_slice %1 {offsets = [0, 33], sizes = [8, 222], strides = [1, 1]} : vector<8x256xf32> to vector<8x222xf32>
    %c56 = arith.constant 56 : index
    %c0_11 = arith.constant 0 : index
    %17 = vector.load %arg5[%c56, %c0_11] : memref<72x512xf32, #tpu.memory_space<vmem>>, vector<8x222xf32>
    tpu.vector_store %arg5[%c56, %c0_11], %16 {strides = array<i32>} : memref<72x512xf32, #tpu.memory_space<vmem>>, vector<8x222xf32>,
    %18 = vector.extract_strided_slice %1 {offsets = [0, 34], sizes = [8, 222], strides = [1, 1]} : vector<8x256xf32> to vector<8x222xf32>
    %c64 = arith.constant 64 : index
    %c0_12 = arith.constant 0 : index
    %19 = vector.load %arg5[%c64, %c0_12] : memref<72x512xf32, #tpu.memory_space<vmem>>, vector<8x222xf32>
    tpu.vector_store %arg5[%c64, %c0_12], %18 {strides = array<i32>} : memref<72x512xf32, #tpu.memory_space<vmem>>, vector<8x222xf32>,
    %c1 = arith.constant 1 : index
    %c0_13 = arith.constant 0 : index
    %c0_14 = arith.constant 0 : index
    %c0_15 = arith.constant 0 : index
    %20 = vector.load %arg1[%c1, %c0_13, %c0_14, %c0_15] : memref<2x1x8x256xf32, #tpu.memory_space<vmem>>, vector<1x1x8x256xf32>
    %21 = vector.shape_cast %20 : vector<1x1x8x256xf32> to vector<8x256xf32>
    %22 = vector.extract_strided_slice %21 {offsets = [0, 0], sizes = [8, 222], strides = [1, 1]} : vector<8x256xf32> to vector<8x222xf32>
    %c0_16 = arith.constant 0 : index
    %c256 = arith.constant 256 : index
    %23 = vector.load %arg5[%c0_16, %c256] : memref<72x512xf32, #tpu.memory_space<vmem>>, vector<8x222xf32>
    tpu.vector_store %arg5[%c0_16, %c256], %22 {strides = array<i32>} : memref<72x512xf32, #tpu.memory_space<vmem>>, vector<8x222xf32>,
    %24 = vector.extract_strided_slice %21 {offsets = [0, 1], sizes = [8, 222], strides = [1, 1]} : vector<8x256xf32> to vector<8x222xf32>
    %c8_17 = arith.constant 8 : index
    %c256_18 = arith.constant 256 : index
    %25 = vector.load %arg5[%c8_17, %c256_18] : memref<72x512xf32, #tpu.memory_space<vmem>>, vector<8x222xf32>
    tpu.vector_store %arg5[%c8_17, %c256_18], %24 {strides = array<i32>} : memref<72x512xf32, #tpu.memory_space<vmem>>, vector<8x222xf32>,
    %26 = vector.extract_strided_slice %21 {offsets = [0, 2], sizes = [8, 222], strides = [1, 1]} : vector<8x256xf32> to vector<8x222xf32>
    %c16_19 = arith.constant 16 : index
    %c256_20 = arith.constant 256 : index
    %27 = vector.load %arg5[%c16_19, %c256_20] : memref<72x512xf32, #tpu.memory_space<vmem>>, vector<8x222xf32>
    tpu.vector_store %arg5[%c16_19, %c256_20], %26 {strides = array<i32>} : memref<72x512xf32, #tpu.memory_space<vmem>>, vector<8x222xf32>,
    %28 = vector.extract_strided_slice %21 {offsets = [0, 16], sizes = [8, 222], strides = [1, 1]} : vector<8x256xf32> to vector<8x222xf32>
    %c24_21 = arith.constant 24 : index
    %c256_22 = arith.constant 256 : index
    %29 = vector.load %arg5[%c24_21, %c256_22] : memref<72x512xf32, #tpu.memory_space<vmem>>, vector<8x222xf32>
    tpu.vector_store %arg5[%c24_21, %c256_22], %28 {strides = array<i32>} : memref<72x512xf32, #tpu.memory_space<vmem>>, vector<8x222xf32>,
    %30 = vector.extract_strided_slice %21 {offsets = [0, 17], sizes = [8, 222], strides = [1, 1]} : vector<8x256xf32> to vector<8x222xf32>
    %c32_23 = arith.constant 32 : index
    %c256_24 = arith.constant 256 : index
    %31 = vector.load %arg5[%c32_23, %c256_24] : memref<72x512xf32, #tpu.memory_space<vmem>>, vector<8x222xf32>
    tpu.vector_store %arg5[%c32_23, %c256_24], %30 {strides = array<i32>} : memref<72x512xf32, #tpu.memory_space<vmem>>, vector<8x222xf32>,
    %32 = vector.extract_strided_slice %21 {offsets = [0, 18], sizes = [8, 222], strides = [1, 1]} : vector<8x256xf32> to vector<8x222xf32>
    %c40_25 = arith.constant 40 : index
    %c256_26 = arith.constant 256 : index
    %33 = vector.load %arg5[%c40_25, %c256_26] : memref<72x512xf32, #tpu.memory_space<vmem>>, vector<8x222xf32>
    tpu.vector_store %arg5[%c40_25, %c256_26], %32 {strides = array<i32>} : memref<72x512xf32, #tpu.memory_space<vmem>>, vector<8x222xf32>,
    %34 = vector.extract_strided_slice %21 {offsets = [0, 32], sizes = [8, 222], strides = [1, 1]} : vector<8x256xf32> to vector<8x222xf32>
    %c48_27 = arith.constant 48 : index
    %c256_28 = arith.constant 256 : index
    %35 = vector.load %arg5[%c48_27, %c256_28] : memref<72x512xf32, #tpu.memory_space<vmem>>, vector<8x222xf32>
    tpu.vector_store %arg5[%c48_27, %c256_28], %34 {strides = array<i32>} : memref<72x512xf32, #tpu.memory_space<vmem>>, vector<8x222xf32>,
    %36 = vector.extract_strided_slice %21 {offsets = [0, 33], sizes = [8, 222], strides = [1, 1]} : vector<8x256xf32> to vector<8x222xf32>
    %c56_29 = arith.constant 56 : index
    %c256_30 = arith.constant 256 : index
    %37 = vector.load %arg5[%c56_29, %c256_30] : memref<72x512xf32, #tpu.memory_space<vmem>>, vector<8x222xf32>
    tpu.vector_store %arg5[%c56_29, %c256_30], %36 {strides = array<i32>} : memref<72x512xf32, #tpu.memory_space<vmem>>, vector<8x222xf32>,
    %38 = vector.extract_strided_slice %21 {offsets = [0, 34], sizes = [8, 222], strides = [1, 1]} : vector<8x256xf32> to vector<8x222xf32>
    %c64_31 = arith.constant 64 : index
    %c256_32 = arith.constant 256 : index
    %39 = vector.load %arg5[%c64_31, %c256_32] : memref<72x512xf32, #tpu.memory_space<vmem>>, vector<8x222xf32>
    tpu.vector_store %arg5[%c64_31, %c256_32], %38 {strides = array<i32>} : memref<72x512xf32, #tpu.memory_space<vmem>>, vector<8x222xf32>,
    %c0_33 = arith.constant 0 : index
    %c0_34 = arith.constant 0 : index
    %40 = vector.load %arg2[%c0_33, %c0_34] : memref<8x72xf32, #tpu.memory_space<vmem>>, vector<8x72xf32>
    %c0_35 = arith.constant 0 : index
    %c0_36 = arith.constant 0 : index
    %41 = vector.load %arg5[%c0_35, %c0_36] : memref<72x512xf32, #tpu.memory_space<vmem>>, vector<72x512xf32>
    %cst = arith.constant dense<0.000000e+00> : vector<8x512xf32>
    %42 = tpu.matmul %40, %41, %cst {dimension_numbers = #tpu.dot_dimension_numbers<[1], [0], [0], [1], [0, 0, 1, 1], [], []>} : vector<8x72xf32>, vector<72x512xf32>, vector<8x512xf32> -> vector<8x512xf32>
    %c0_37 = arith.constant 0 : index
    %c0_38 = arith.constant 0 : index
    %43 = vector.load %arg3[%c0_37, %c0_38] : memref<8x1xf32, #tpu.memory_space<vmem>>, vector<8x1xf32>
    %44 = vector.broadcast %43 : vector<8x1xf32> to vector<8x512xf32>
    %45 = arith.addf %42, %44 : vector<8x512xf32>
    %46 = vector.extract_strided_slice %45 {offsets = [0, 0], sizes = [8, 256], strides = [1, 1]} : vector<8x512xf32> to vector<8x256xf32>
    %c0_39 = arith.constant 0 : index
    %c0_40 = arith.constant 0 : index
    %c0_41 = arith.constant 0 : index
    %47 = vector.load %arg4[%c0_39, %c0_40, %c0_41] : memref<2x8x256xf32, #tpu.memory_space<vmem>>, vector<1x8x256xf32>
    %48 = vector.shape_cast %47 : vector<1x8x256xf32> to vector<8x256xf32>
    %49 = vector.shape_cast %46 : vector<8x256xf32> to vector<1x8x256xf32>
    tpu.vector_store %arg4[%c0_39, %c0_40, %c0_41], %49 {strides = array<i32>} : memref<2x8x256xf32, #tpu.memory_space<vmem>>, vector<1x8x256xf32>,
    %50 = vector.extract_strided_slice %45 {offsets = [0, 256], sizes = [8, 256], strides = [1, 1]} : vector<8x512xf32> to vector<8x256xf32>
    %c1_42 = arith.constant 1 : index
    %c0_43 = arith.constant 0 : index
    %c0_44 = arith.constant 0 : index
    %51 = vector.load %arg4[%c1_42, %c0_43, %c0_44] : memref<2x8x256xf32, #tpu.memory_space<vmem>>, vector<1x8x256xf32>
    %52 = vector.shape_cast %51 : vector<1x8x256xf32> to vector<8x256xf32>
    %53 = vector.shape_cast %50 : vector<8x256xf32> to vector<1x8x256xf32>
    tpu.vector_store %arg4[%c1_42, %c0_43, %c0_44], %53 {strides = array<i32>} : memref<2x8x256xf32, #tpu.memory_space<vmem>>, vector<1x8x256xf32>,
    return
  }
  func.func @transform_0(%arg0: i32) -> (i32, i32, i32, i32) {
    %c0_i32 = arith.constant 0 : i32
    %c0_i32_0 = arith.constant 0 : i32
    %c0_i32_1 = arith.constant 0 : i32
    %c0_i32_2 = arith.constant 0 : i32
    %c0_i32_3 = arith.constant 0 : i32
    return %c0_i32, %c0_i32_0, %c0_i32_1, %c0_i32_2 : i32, i32, i32, i32
  }
  func.func @transform_1(%arg0: i32) -> (i32, i32) {
    %c0_i32 = arith.constant 0 : i32
    %c0_i32_0 = arith.constant 0 : i32
    %c0_i32_1 = arith.constant 0 : i32
    return %c0_i32, %c0_i32_0 : i32, i32
  }
  func.func @transform_2(%arg0: i32) -> (i32, i32) {
    %c0_i32 = arith.constant 0 : i32
    %c0_i32_0 = arith.constant 0 : i32
    %c0_i32_1 = arith.constant 0 : i32
    return %c0_i32, %c0_i32_0 : i32, i32
  }
  func.func @transform_3(%arg0: i32) -> (i32, i32, i32) {
    %c0_i32 = arith.constant 0 : i32
    %c0_i32_0 = arith.constant 0 : i32
    %c0_i32_1 = arith.constant 0 : i32
    %c0_i32_2 = arith.constant 0 : i32
    return %c0_i32, %c0_i32_0, %c0_i32_1 : i32, i32, i32
  }
}

</mosaic_0001>

<bundles_post_ra>
// kernel: _conv_forward.1
= control target key start
LH: loop header
LB: loop body
LE: loop exit
PB: predicated region body
PF: predicated region fallthrough
CT: control target
= control target key end

     0   :  { %vm17_vm0 = vcmask 769024   ;;  %s426_s18 = smov 127   ;;  %s427_s21 = smov 126   ;;  %v433_v4 = vmov 0.0   ;;  %v435_v5 = vmov 0   ;;  %vm25_vm1 = vcmask 1039360   ;;  %s540_s0 = inlined_call_operand.vmem [shape: f32[2,1,8,256], index: 0, kind: input, shape index: {}]   ;;  %s541_s2 = inlined_call_operand.vmem [shape: f32[8,1], index: 2, kind: input, shape index: {}]   ;;  %s542_s1 = inlined_call_operand.vmem [shape: f32[8,72], index: 1, kind: input, shape index: {}]   ;;  %s543_s3 = inlined_call_operand.vmem [shape: f32[2,8,256], index: 3, kind: output, shape index: {}]  }
   0x1   :  { %v459_v0 = vld [vmem:[%s540_s0 + $0x10] sm:$0xff]  ;;  %v464_v1 = vld [vmem:[%s540_s0] sm:$0xff]  ;;  %v378_v2 = vld [vmem:[%s540_s0 + $0x18] sm:$0xff]  ;;  %s428_s22 = smov 112   ;;  %s430_s23 = smov 110   ;;  %290 = vmatprep.mubr.f32.mxu0 %v433_v4  ;;  %361 = vmatprep.mubr.f32.mxu1 %v433_v4  ;;  %vm35_vm2 = vcmask 1031168  }
   0x2   :  { %107 = vrot.lane.b32.xlu1 %v459_v0, %s426_s18  ;;  %21 = vrot.lane.b32.xlu0 %v464_v1, %s426_s18  ;;  %v15_v3 = vld [vmem:[%s540_s0 + $0x8] sm:$0xff]  ;;  %104 = vst.msk [vmem:[#allocation2 + $0x18] sm:$0xff] %vm17_vm0, %v378_v2  ;;  %s429_s0 = smov 111   ;;  %s431_s24 = smov 96   ;;  %v216_v6 = vld [vmem:[%s541_s2] sm:$0xff]  ;;  %vm45_vm3 = vcmask 916480  }
   0x3   :  { %18 = vst.msk [vmem:[#allocation2 + $0x8] sm:$0xff] %vm17_vm0, %v15_v3  ;;  %s432_s25 = smov 95   ;;  %s434_s26 = smov 94   ;;  %425 = vset.pattern.permute.xlu0 %v435_v5  ;;  %vm55_vm4 = vcmask 908288   ;;  %vm65_vm5 = vcmask 900096   ;;  %vm75_vm6 = vcmask 785408  }
   0x4   :  { %vm85_vm7 = vcmask 777216   ;;  %vm222_vm8 = vcmask 588800  }
   0x6   :  { %109 = vrot.lane.b32.xlu1 %v378_v2, %s426_s18  ;;  %23 = vrot.lane.b32.xlu0 %v15_v3, %s426_s18 }
   0x9   :  { %v183_v17 = vld [vmem:[#allocation2 + $0x18] sm:$0xff] }
   0xa   :  { %33 = vrot.lane.b32.xlu1 %v15_v3, %s427_s21  ;;  %31 = vrot.lane.b32.xlu0 %v464_v1, %s427_s21  ;;  %v181_v16 = vld [vmem:[#allocation2 + $0x8] sm:$0xff] }
   0xe   :  { %43 = vrot.lane.b32.xlu1 %v15_v3, %s428_s22  ;;  %41 = vrot.lane.b32.xlu0 %v464_v1, %s428_s22 }
  0x12   :  { %118 = vrot.lane.b32.xlu1 %v378_v2, %s427_s21  ;;  %116 = vrot.lane.b32.xlu0 %v459_v0, %s427_s21 }
  0x16   :  { %127 = vrot.lane.b32.xlu1 %v378_v2, %s428_s22  ;;  %125 = vrot.lane.b32.xlu0 %v459_v0, %s428_s22 }
  0x1a   :  { %53 = vrot.lane.b32.xlu1 %v15_v3, %s429_s0  ;;  %51 = vrot.lane.b32.xlu0 %v464_v1, %s429_s0 }
  0x1e   :  { %63 = vrot.lane.b32.xlu1 %v15_v3, %s430_s23  ;;  %61 = vrot.lane.b32.xlu0 %v464_v1, %s430_s23 }
  0x22   :  { %136 = vrot.lane.b32.xlu1 %v378_v2, %s429_s0  ;;  %134 = vrot.lane.b32.xlu0 %v459_v0, %s429_s0 }
  0x26   :  { %145 = vrot.lane.b32.xlu1 %v378_v2, %s430_s23  ;;  %143 = vrot.lane.b32.xlu0 %v459_v0, %s430_s23 }
  0x2a   :  { %73 = vrot.lane.b32.xlu1 %v15_v3, %s431_s24  ;;  %71 = vrot.lane.b32.xlu0 %v464_v1, %s431_s24 }
  0x2e   :  { %83 = vrot.lane.b32.xlu1 %v15_v3, %s432_s25  ;;  %81 = vrot.lane.b32.xlu0 %v464_v1, %s432_s25 }
  0x32   :  { %154 = vrot.lane.b32.xlu1 %v378_v2, %s431_s24  ;;  %152 = vrot.lane.b32.xlu0 %v459_v0, %s431_s24 }
  0x36   :  { %163 = vrot.lane.b32.xlu1 %v378_v2, %s432_s25  ;;  %161 = vrot.lane.b32.xlu0 %v459_v0, %s432_s25 }
  0x3a   :  { %93 = vrot.lane.b32.xlu1 %v15_v3, %s434_s26  ;;  %91 = vrot.lane.b32.xlu0 %v464_v1, %s434_s26 }
  0x3e   :  { %172 = vrot.lane.b32.xlu1 %v378_v2, %s434_s26  ;;  %170 = vrot.lane.b32.xlu0 %v459_v0, %s434_s26 }
  0x42   :  { %219 = vperm.xlu0 %425, %v216_v6  }
  0x74   :  { %v108_v7 = vpop.permute.xlu1 %107  ;;  %v22_v8 = vpop.permute.xlu0 %21 }
  0x78   :  { %v110_v9 = vpop.permute.xlu1 %109  ;;  %v24_v10 = vpop.permute.xlu0 %23 }
  0x79   :  { %v111_v11 = vsel %vm25_vm1, %v108_v7, %v110_v9  ;;  %115 = vst.msk [vmem:[#allocation2 + $0x38] sm:$0xff] %vm17_vm0, %v110_v9  ;;  %v26_v12 = vsel %vm25_vm1, %v22_v8, %v24_v10  ;;  %30 = vst.msk [vmem:[#allocation2 + $0x28] sm:$0xff] %vm17_vm0, %v24_v10 }
  0x7a   :  { %v401_v25 = vpack.c.bf16 %v111_v11, %v459_v0  ;;  %v385_v26 = vpack.c.bf16 %v26_v12, %v464_v1 }
  0x7c   :  { %v34_v13 = vpop.permute.xlu1 %33  ;;  %v32_v14 = vpop.permute.xlu0 %31 }
  0x7d   :  { %40 = vst.msk [vmem:[#allocation2 + $0x48] sm:$0xff] %vm17_vm0, %v34_v13  ;;  %v36_v15 = vsel %vm35_vm2, %v32_v14, %v34_v13 }
  0x80   :  { %v44_v18 = vpop.permute.xlu1 %43  ;;  %v42_v19 = vpop.permute.xlu0 %41  ;;  %v185_v20 = vld [vmem:[#allocation2 + $0x28] sm:$0xff]  ;;  %v187_v21 = vld [vmem:[#allocation2 + $0x38] sm:$0xff] }
  0x81   :  { %50 = vst.msk [vmem:[#allocation2 + $0x68] sm:$0xff] %vm17_vm0, %v44_v18  ;;  %v46_v22 = vsel %vm45_vm3, %v42_v19, %v44_v18  ;;  %v383_v23 = vpack.c.bf16 %v185_v20, %v181_v16  ;;  %v399_v24 = vpack.c.bf16 %v187_v21, %v183_v17 }
  0x82   :  { %v389_v36 = vpack.c.bf16 %v46_v22, %v36_v15 }
  0x83   :  { %384 = vmatprep.subr.bf16.mxu0 %v383_v23  ;;  %400 = vmatprep.subr.bf16.mxu1 %v399_v24  ;;  %v179_v24 = vld [vmem:[%s542_s1] sm:$0xff] }
  0x84   :  { %402 = vmatpush1.bf16.msra.mxu1 %v401_v25  ;;  %v119_v27 = vpop.permute.xlu1 %118  ;;  %v117_v28 = vpop.permute.xlu0 %116  ;;  %386 = vmatpush1.bf16.msra.mxu0 %v385_v26  ;;  %v189_v32 = vld [vmem:[#allocation2 + $0x48] sm:$0xff] }
  0x85   :  { %124 = vst.msk [vmem:[#allocation2 + $0x58] sm:$0xff] %vm17_vm0, %v119_v27  ;;  %v120_v29 = vsel %vm35_vm2, %v117_v28, %v119_v27 }
  0x88   :  { %v128_v30 = vpop.permute.xlu1 %127  ;;  %v126_v31 = vpop.permute.xlu0 %125  ;;  %v193_v33 = vld [vmem:[#allocation2 + $0x68] sm:$0xff] }
  0x89   :  { %133 = vst.msk [vmem:[#allocation2 + $0x78] sm:$0xff] %vm17_vm0, %v128_v30  ;;  %v129_v34 = vsel %vm45_vm3, %v126_v31, %v128_v30  ;;  %v387_v35 = vpack.c.bf16 %v193_v33, %v189_v32 }
  0x8a   :  { %v405_v46 = vpack.c.bf16 %v129_v34, %v120_v29 }
  0x8b   :  { %388 = vmatprep.subr.bf16.mxu0 %v387_v35 }
  0x8c   :  { %v54_v37 = vpop.permute.xlu1 %53  ;;  %v52_v38 = vpop.permute.xlu0 %51  ;;  %390 = vmatpush1.bf16.msra.mxu0 %v389_v36  ;;  %v191_v42 = vld [vmem:[#allocation2 + $0x58] sm:$0xff] }
  0x8d   :  { %60 = vst.msk [vmem:[#allocation2 + $0x88] sm:$0xff] %vm17_vm0, %v54_v37  ;;  %v56_v39 = vsel %vm55_vm4, %v52_v38, %v54_v37 }
  0x90   :  { %v64_v40 = vpop.permute.xlu1 %63  ;;  %v62_v41 = vpop.permute.xlu0 %61  ;;  %v195_v43 = vld [vmem:[#allocation2 + $0x78] sm:$0xff] }
  0x91   :  { %70 = vst.msk [vmem:[#allocation2 + $0xa8] sm:$0xff] %vm17_vm0, %v64_v40  ;;  %v66_v44 = vsel %vm65_vm5, %v62_v41, %v64_v40  ;;  %v403_v45 = vpack.c.bf16 %v195_v43, %v191_v42 }
  0x92   :  { %v393_v56 = vpack.c.bf16 %v66_v44, %v56_v39 }
  0x93   :  { %404 = vmatprep.subr.bf16.mxu1 %v403_v45 }
  0x94   :  { %v137_v47 = vpop.permute.xlu1 %136  ;;  %406 = vmatpush1.bf16.msra.mxu1 %v405_v46  ;;  %v135_v48 = vpop.permute.xlu0 %134  ;;  %v197_v52 = vld [vmem:[#allocation2 + $0x88] sm:$0xff] }
  0x95   :  { %142 = vst.msk [vmem:[#allocation2 + $0x98] sm:$0xff] %vm17_vm0, %v137_v47  ;;  %v138_v49 = vsel %vm55_vm4, %v135_v48, %v137_v47 }
  0x98   :  { %v146_v50 = vpop.permute.xlu1 %145  ;;  %v144_v51 = vpop.permute.xlu0 %143  ;;  %v201_v53 = vld [vmem:[#allocation2 + $0xa8] sm:$0xff] }
  0x99   :  { %151 = vst.msk [vmem:[#allocation2 + $0xb8] sm:$0xff] %vm17_vm0, %v146_v50  ;;  %v147_v54 = vsel %vm65_vm5, %v144_v51, %v146_v50  ;;  %v391_v55 = vpack.c.bf16 %v201_v53, %v197_v52 }
  0x9a   :  { %v409_v2 = vpack.c.bf16 %v147_v54, %v138_v49 }
  0x9b   :  { %392 = vmatprep.subr.bf16.mxu0 %v391_v55 }
  0x9c   :  { %v74_v57 = vpop.permute.xlu1 %73  ;;  %v72_v58 = vpop.permute.xlu0 %71  ;;  %394 = vmatpush1.bf16.msra.mxu0 %v393_v56  ;;  %v199_v62 = vld [vmem:[#allocation2 + $0x98] sm:$0xff] }
  0x9d   :  { %80 = vst.msk [vmem:[#allocation2 + $0xc8] sm:$0xff] %vm17_vm0, %v74_v57  ;;  %v76_v59 = vsel %vm75_vm6, %v72_v58, %v74_v57 }
  0xa0   :  { %v84_v60 = vpop.permute.xlu1 %83  ;;  %v82_v61 = vpop.permute.xlu0 %81  ;;  %v203_v63 = vld [vmem:[#allocation2 + $0xb8] sm:$0xff] }
  0xa1   :  { %90 = vst.msk [vmem:[#allocation2 + $0xe8] sm:$0xff] %vm17_vm0, %v84_v60  ;;  %v86_v0 = vsel %vm85_vm7, %v82_v61, %v84_v60  ;;  %v407_v1 = vpack.c.bf16 %v203_v63, %v199_v62 }
  0xa2   :  { %v397_v12 = vpack.c.bf16 %v86_v0, %v76_v59 }
  0xa3   :  { %408 = vmatprep.subr.bf16.mxu1 %v407_v1 }
  0xa4   :  { %v155_v3 = vpop.permute.xlu1 %154  ;;  %410 = vmatpush1.bf16.msra.mxu1 %v409_v2  ;;  %v153_v4 = vpop.permute.xlu0 %152  ;;  %v205_v8 = vld [vmem:[#allocation2 + $0xc8] sm:$0xff] }
  0xa5   :  { %160 = vst.msk [vmem:[#allocation2 + $0xd8] sm:$0xff] %vm17_vm0, %v155_v3  ;;  %v156_v5 = vsel %vm75_vm6, %v153_v4, %v155_v3 }
  0xa8   :  { %v164_v6 = vpop.permute.xlu1 %163  ;;  %v162_v7 = vpop.permute.xlu0 %161  ;;  %v209_v9 = vld [vmem:[#allocation2 + $0xe8] sm:$0xff] }
  0xa9   :  { %169 = vst.msk [vmem:[#allocation2 + $0xf8] sm:$0xff] %vm17_vm0, %v164_v6  ;;  %v165_v10 = vsel %vm85_vm7, %v162_v7, %v164_v6  ;;  %v395_v11 = vpack.c.bf16 %v209_v9, %v205_v8 }
  0xaa   :  { %v413_v22 = vpack.c.bf16 %v165_v10, %v156_v5 }
  0xab   :  { %396 = vmatprep.subr.bf16.mxu0 %v395_v11 }
  0xac   :  { %v94_v13 = vpop.permute.xlu1 %93  ;;  %v92_v14 = vpop.permute.xlu0 %91  ;;  %398 = vmatpush1.bf16.msra.mxu0 %v397_v12  ;;  %v207_v18 = vld [vmem:[#allocation2 + $0xd8] sm:$0xff] }
  0xad   :  { %99 = vst.msk [vmem:[#allocation2 + $0x108] sm:$0xff] %vm17_vm0, %v94_v13  ;;  %v95_v15 = vsel %vm17_vm0, %v92_v14, %v94_v13 }
  0xb0   :  { %v173_v16 = vpop.permute.xlu1 %172  ;;  %v171_v17 = vpop.permute.xlu0 %170  ;;  %v211_v19 = vld [vmem:[#allocation2 + $0xf8] sm:$0xff] }
  0xb1   :  { %178 = vst.msk [vmem:[#allocation2 + $0x118] sm:$0xff] %vm17_vm0, %v173_v16  ;;  %v174_v20 = vsel %vm17_vm0, %v171_v17, %v173_v16  ;;  %v411_v21 = vpack.c.bf16 %v211_v19, %v207_v18 }
  0xb3   :  { %412 = vmatprep.subr.bf16.mxu1 %v411_v21 }
  0xb4   :  { %414 = vmatpush1.bf16.msra.mxu1 %v413_v22  ;;  %v213_v23 = vld [vmem:[#allocation2 + $0x108] sm:$0xff] }
  0xb5   :  { %242 = vmatprep.subr.mxu0 %v213_v23 }
  0xb6   :  { %243 = vmatpush1.msra.mxu0 %v95_v15 }
  0xb7   :  { %379 = vmatmul.mubr.msk.f32.vlgmr.msra.gmra.mrb[0].mxu0 %vm222_vm8, %v179_v24 }
  0xb8   :  { %v215_v25 = vld [vmem:[#allocation2 + $0x118] sm:$0xff] }
  0xb9   :  { %313 = vmatprep.subr.mxu1 %v215_v25 }
  0xba   :  { %314 = vmatpush1.msra.mxu1 %v174_v20 }
  0xbb   :  { %380 = vmatmul.mubr.msk.f32.vlgmr.msra.gmra.mrb[0].mxu1 %vm222_vm8, %v179_v24 }
  0xc1   :  { %v220_v26 = vpop.permute.xlu0 %219 }
 0x18a   :  { %v292_v27 = vpop.f32.mrb[0].mxu0 }
 0x18b   :  { %v293_v28 = vadd.f32 %v292_v27, %v220_v26  ;;  %v294_v29 = vpop.f32.mrb[1].mxu0 }
 0x18c   :  { %v295_v30 = vadd.f32 %v294_v29, %v220_v26 }
 0x18d   :  { %368 = vst [vmem:[%s543_s3] sm:$0xff] %v293_v28 }
 0x18e   :  { %v363_v31 = vpop.f32.mrb[0].mxu1  ;;  %369 = vst [vmem:[%s543_s3 + $0x8] sm:$0xff] %v295_v30 }
 0x18f   :  { %v364_v32 = vadd.f32 %v363_v31, %v220_v26  ;;  %v365_v33 = vpop.f32.mrb[1].mxu1 }
 0x190   :  { %v366_v34 = vadd.f32 %v365_v33, %v220_v26 }
 0x191   :  { %381 = vst [vmem:[%s543_s3 + $0x10] sm:$0xff] %v364_v32 }
 0x192   :  { %382 = vst [vmem:[%s543_s3 + $0x18] sm:$0xff] %v366_v34 }

</bundles_post_ra>
